<compile_context>
chip_gen: v5e
topology: v5e:2x2
jax: 0.10.0
libtpu: 0.0.40
codegen_flags: <defaults>
</compile_context>

<pallas_src>
import math

import jax
import jax.numpy as jnp
from jax.experimental import pallas as pl
from jax.experimental.pallas import tpu as pltpu


# ---------------------------------------------------------------------------
# Positional-encoding table (equivalent of the registered buffer)
# ---------------------------------------------------------------------------
def make_pos_embedding(embedding_dim: int, max_seq_len: int) -> jnp.ndarray:
    den = jnp.exp(-jnp.arange(0, embedding_dim, 2, dtype=jnp.float32)
                  * math.log(10000.0) / embedding_dim)                  # (E/2,)
    pos = jnp.arange(0, max_seq_len, dtype=jnp.float32).reshape(-1, 1)  # (S,1)
    ang = pos * den                                                     # (S,E/2)
    pe = jnp.zeros((max_seq_len, embedding_dim), dtype=jnp.float32)
    pe = pe.at[:, 0::2].set(jnp.sin(ang))
    pe = pe.at[:, 1::2].set(jnp.cos(ang))
    return pe[:, None, :]   # (max_seq_len, 1, embedding_dim)


# ---------------------------------------------------------------------------
# Pallas kernels (lane-dense 2D tiles)
# ---------------------------------------------------------------------------
def _broadcast_pos(pos_tile, lane_width):
    """(TS, E) positional tile -> (TS, B*E), replicated along the lane axis."""
    reps = lane_width // pos_tile.shape[1]
    if reps == 1:
        return pos_tile
    return jnp.tile(pos_tile, (1, reps))


def _pe_eval_kernel(x_ref, pos_ref, o_ref):
    # x_ref / o_ref: (TS, B*E); pos_ref: (TS, E)
    o_ref[...] = x_ref[...] + _broadcast_pos(pos_ref[...], x_ref.shape[1])


def _pe_train_kernel(x_ref, pos_ref, mask_ref, o_ref):
    # mask_ref holds 0 or 1/(1-p): inverted dropout applied to (x + pos).
    y = x_ref[...] + _broadcast_pos(pos_ref[...], x_ref.shape[1])
    o_ref[...] = y * mask_ref[...]


# ---------------------------------------------------------------------------
# Wrapper
# ---------------------------------------------------------------------------
def _pick_tile_rows(S: int, row_bytes: int, target_bytes: int = 2 << 20) -> int:
    """Largest sequence tile (multiple of 8, or the full S) whose per-buffer
    size stays ~target_bytes; sized conservatively for v7x's 32 MiB scoped
    VMEM with double-buffered x / mask / out streams."""
    if S <= 8:
        return S
    ts = target_bytes // max(row_bytes, 1)
    if ts >= S:
        return S
    return max(8, (ts // 8) * 8)


def positional_encoding(token_embedding: jnp.ndarray,
                        pos_embedding: jnp.ndarray,
                        *,
                        dropout_p: float = 0.05,
                        training: bool = False,
                        rng_key=None) -> jnp.ndarray:
    """token_embedding: (S, B, E); pos_embedding: (max_seq_len, 1, E)."""
    S, B, E = token_embedding.shape
    dtype = token_embedding.dtype

    # Lane-dense views (plain-JAX glue: reshape/slice only).
    x2d = token_embedding.reshape(S, B * E)
    pos2d = pos_embedding[:S, 0, :].astype(dtype)        # (S, E)

    row_bytes = B * E * jnp.dtype(dtype).itemsize
    TS = _pick_tile_rows(S, row_bytes)
    grid = (pl.cdiv(S, TS),)

    x_spec = pl.BlockSpec((TS, B * E), lambda i: (i, 0))
    pos_spec = pl.BlockSpec((TS, E), lambda i: (i, 0))
    out_spec = pl.BlockSpec((TS, B * E), lambda i: (i, 0))
    out_shape = jax.ShapeDtypeStruct((S, B * E), dtype)
    cparams = pltpu.CompilerParams(dimension_semantics=("parallel",))

    use_dropout = training and dropout_p > 0.0
    if not use_dropout:
        out2d = pl.pallas_call(
            _pe_eval_kernel,
            out_shape=out_shape,
            grid=grid,
            in_specs=[x_spec, pos_spec],
            out_specs=out_spec,
            compiler_params=cparams,
        )(x2d, pos2d)
    else:
        if dropout_p >= 1.0:
            return jnp.zeros_like(token_embedding)
        if rng_key is None:
            rng_key = jax.random.PRNGKey(0)
        keep = jax.random.bernoulli(rng_key, 1.0 - dropout_p, (S, B * E))
        scale = jnp.asarray(1.0 / (1.0 - dropout_p), dtype)
        mask = keep.astype(dtype) * scale                # 0 or 1/(1-p)
        out2d = pl.pallas_call(
            _pe_train_kernel,
            out_shape=out_shape,
            grid=grid,
            in_specs=[x_spec, pos_spec, x_spec],         # mask tiles like x
            out_specs=out_spec,
            compiler_params=cparams,
        )(x2d, pos2d, mask)

    return out2d.reshape(S, B, E)


# ---------------------------------------------------------------------------
# Demo / self-check
# ---------------------------------------------------------------------------
if __name__ == "__main__":
    S, B, E = 8, 2, 32
    MAX_SEQ_LEN = 64
    DROPOUT_P = 0.05

    key = jax.random.PRNGKey(0)
    k_x, k_drop = jax.random.split(key)
    token_embedding = jax.random.normal(k_x, (S, B, E), dtype=jnp.float32)
    pos_embedding = make_pos_embedding(E, MAX_SEQ_LEN)

    # Eval-mode forward (dropout is identity) — deterministic check.
    out_eval = positional_encoding(token_embedding, pos_embedding,
                                   dropout_p=DROPOUT_P, training=False)
    out_eval = jax.block_until_ready(out_eval)
    ref = token_embedding + pos_embedding[:S]
    assert out_eval.shape == (S, B, E)
    assert jnp.allclose(out_eval, ref, atol=1e-6, rtol=1e-6)

    # Training-mode forward: every element is either 0 (dropped) or the kept
    # value (x + pos) / (1 - p) — check that invariant.
    out_train = positional_encoding(token_embedding, pos_embedding,
                                    dropout_p=DROPOUT_P, training=True,
                                    rng_key=k_drop)
    out_train = jax.block_until_ready(out_train)
    assert out_train.shape == (S, B, E)
    kept = ref / (1.0 - DROPOUT_P)
    ok = (jnp.isclose(out_train, 0.0, atol=1e-6)
          | jnp.isclose(out_train, kept, atol=1e-5, rtol=1e-5))
    assert bool(jnp.all(ok))

    print("KERNEL_OK")
</pallas_src>

<mosaic_0001>
module attributes {stable_mosaic.version = 11 : i64} {
  func.func @_pe_eval_kernel(%arg0: i32, %arg1: memref<8x64xf32, #tpu.memory_space<vmem>>, %arg2: memref<8x32xf32, #tpu.memory_space<vmem>>, %arg3: memref<8x64xf32, #tpu.memory_space<vmem>>) attributes {dimension_semantics = [#tpu.dimension_semantics<parallel>], iteration_bounds = array<i64: 1>, scalar_prefetch = 0 : i64, scratch_operands = 0 : i64, tpu.core_type = #tpu.core_type<tc>, window_params = [{transform_indices = @transform_0, window_bounds = array<i64: 8, 64>}, {transform_indices = @transform_1, window_bounds = array<i64: 8, 32>}, {transform_indices = @transform_2, window_bounds = array<i64: 8, 64>}]} {
    %c0 = arith.constant 0 : index
    %c0_0 = arith.constant 0 : index
    %0 = vector.load %arg1[%c0, %c0_0] : memref<8x64xf32, #tpu.memory_space<vmem>>, vector<8x64xf32>
    %c0_1 = arith.constant 0 : index
    %c0_2 = arith.constant 0 : index
    %1 = vector.load %arg2[%c0_1, %c0_2] : memref<8x32xf32, #tpu.memory_space<vmem>>, vector<8x32xf32>
    %2 = tpu.concatenate %1, %1 in 1 : vector<8x32xf32>, vector<8x32xf32> -> vector<8x64xf32>
    %3 = arith.addf %0, %2 : vector<8x64xf32>
    %c0_3 = arith.constant 0 : index
    %c0_4 = arith.constant 0 : index
    %4 = vector.load %arg3[%c0_3, %c0_4] : memref<8x64xf32, #tpu.memory_space<vmem>>, vector<8x64xf32>
    tpu.vector_store %arg3[%c0_3, %c0_4], %3 {strides = array<i32>} : memref<8x64xf32, #tpu.memory_space<vmem>>, vector<8x64xf32>,
    return
  }
  func.func @transform_0(%arg0: i32) -> (i32, i32) {
    %c0_i32 = arith.constant 0 : i32
    %c0_i32_0 = arith.constant 0 : i32
    return %arg0, %c0_i32 : i32, i32
  }
  func.func @transform_1(%arg0: i32) -> (i32, i32) {
    %c0_i32 = arith.constant 0 : i32
    %c0_i32_0 = arith.constant 0 : i32
    return %arg0, %c0_i32 : i32, i32
  }
  func.func @transform_2(%arg0: i32) -> (i32, i32) {
    %c0_i32 = arith.constant 0 : i32
    %c0_i32_0 = arith.constant 0 : i32
    return %arg0, %c0_i32 : i32, i32
  }
}

</mosaic_0001>

<bundles_post_ra>
// kernel: tpu_custom_call.1
= control target key start
LH: loop header
LB: loop body
LE: loop exit
PB: predicated region body
PF: predicated region fallthrough
CT: control target
= control target key end

     0   :  { %7 = vsyncpa [#allocation3], 0  ;;  %s179_s0 = inlined_call_operand.hbm [shape: f32[8,64], index: 0, kind: input, shape index: {}]   ;;  %s180_s1 = inlined_call_operand.hbm [shape: f32[8,32], index: 1, kind: input, shape index: {}]   ;;  %s181_s2 = inlined_call_operand.hbm [shape: f32[8,64], index: 2, kind: output, shape index: {}]  }
   0x1   :  { %8 = vsyncpa [#allocation6], 0 }
   0x2   :  { %9 = vsyncpa [#allocation4], 0  ;;  %s15_s11 = sshll.u32 %s179_s0, 4  ;;  %s151_s12 = smov [#allocation2]   ;;  %s16_s11 = int_to_ptr.hbm [resolvable:$true] %s15_s11 }
   0x3   :  { %s17_s13 = sshll.u32 %s151_s12, 4  ;;  %s26_s16 = sshll.u32 %s180_s1, 4  ;;  %s18_s13 = int_to_ptr.vmem [resolvable:$true] %s17_s13  ;;  %s27_s16 = int_to_ptr.hbm [resolvable:$true] %s26_s16 }
   0x4   :  { %20 = dma.hbm_to_vmem [thread:$0]  %s16_s11, 128, %s18_s13, [#allocation3]  }
   0x5   :  { %s152_s17 = smov [#allocation5]  }
   0x6   :  { %s28_s18 = sshll.u32 %s152_s17, 4  ;;  %s29_s18 = int_to_ptr.vmem [resolvable:$true] %s28_s18 }
   0x7   :  { %31 = dma.hbm_to_vmem [thread:$0]  %s27_s16, 128, %s29_s18, [#allocation6]  }
   0x8   :  { %145 = dma.done.wait [#allocation3], 128  }
   0x9   :  { %146 = vsyncadd [#allocation3], 4294967168 }
   0xa   :  { %147 = dma.done.wait [#allocation6], 128  }
   0xb   :  { %148 = vsyncadd [#allocation6], 4294967168  ;;  %v41_v0 = vld [vmem:[#allocation5] sm:$0xff]  ;;  %s153_s0 = smov 32   ;;  %vm46_vm0 = vcmask 261120   ;;  %v40_v1 = vld [vmem:[#allocation2] sm:$0xff] }
   0xc   :  { %43 = vrot.lane.b32.xlu0 %v41_v0, %s153_s0  ;;  %s154_s19 = smov [#allocation7]   ;;  %s58_s1 = sshll.u32 %s181_s2, 4  ;;  %vm49_vm1 = vcmask 523264   ;;  %s59_s1 = int_to_ptr.hbm [resolvable:$true] %s58_s1 }
   0xd   :  { %s56_s20 = sshll.u32 %s154_s19, 4  ;;  %s57_s20 = int_to_ptr.vmem [resolvable:$true] %s56_s20 }
  0x7e   :  { %v44_v2 = vpop.permute.xlu0 %43 }
  0x7f   :  { %v47_v3 = vsel %vm46_vm0, %v41_v0, %v44_v2 }
  0x80   :  { %v48_v4 = vadd.f32 %v47_v3, %v40_v1 }
  0x82   :  { %50 = vst.msk [vmem:[#allocation7] sm:$0xff] %vm49_vm1, %v48_v4 }
  0x83   :  { %61 = dma.vmem_to_hbm [thread:$0]  %s57_s20, 128, %s59_s1, [#allocation4]  }
  0x84   :  { %149 = dma.done.wait [#allocation4], 128  }
  0x85   :  { %150 = vsyncadd [#allocation4], 4294967168 }
  0x86   :  { %66 = vsyncpa [#allocation3], 1 }
  0x87   :  { %67 = vsyncpa [#allocation6], 1 }
  0x88   :  { %68 = vsyncpa [#allocation4], 1 }

</bundles_post_ra>
